<compile_context>
chip_gen: v7x
topology: tpu7x:2x2x1
jax: 0.10.0
libtpu: 0.0.40
codegen_flags: <defaults>
</compile_context>

<pallas_src>
import math

import jax
import jax.numpy as jnp
import numpy as np
from jax import lax
from jax.experimental import pallas as pl
from jax.experimental.pallas import tpu as pltpu


def _interp_coeffs(in_size: int, out_size: int, align_corners: bool) -> np.ndarray:
    """1-D linear interpolation matrix W (out_size, in_size), PyTorch semantics."""
    o = np.arange(out_size, dtype=np.float64)
    if align_corners:
        if out_size > 1:
            src = o * (in_size - 1) / (out_size - 1)
        else:
            src = np.zeros(out_size, dtype=np.float64)
    else:
        scale = in_size / out_size
        src = np.maximum((o + 0.5) * scale - 0.5, 0.0)   # PyTorch clamps negatives
    low = np.clip(np.floor(src).astype(np.int64), 0, in_size - 1)
    high = np.clip(low + 1, 0, in_size - 1)
    frac = src - low
    w = np.zeros((out_size, in_size), dtype=np.float64)
    rows = np.arange(out_size)
    np.add.at(w, (rows, low), 1.0 - frac)
    np.add.at(w, (rows, high), frac)
    return w.astype(np.float32)


def _round_up(v: int, m: int) -> int:
    return ((v + m - 1) // m) * m


def _interp_kernel(wwt_ref, whg_ref, x_ref, o_ref):
    # wwt_ref: (Wi, Wo)        f32 W-pass weights, pre-transposed (shared)
    # whg_ref: (G*Ho, G*Hi)    f32 kron(I_G, Wh) -- H-pass weights (shared)
    # x_ref  : (Bc*Hi, Wi)     Bc channels stacked on the sublane axis (raw NCHW view)
    # o_ref  : (Bc*Ho, Wo)
    gho, ghi = whg_ref.shape
    wo = wwt_ref.shape[1]

    x = x_ref[...].astype(jnp.float32)
    # W-pass: one big MXU matmul over all Bc*Hi rows, f32 accumulation.
    t = jnp.dot(x, wwt_ref[...], preferred_element_type=jnp.float32)     # (Bc*Hi, Wo)

    # H-pass: batched over the Bc/G channel groups; the f32 intermediate feeds
    # the second matmul directly (no intermediate downcast -> single rounding).
    bcg = t.shape[0] // ghi
    t3 = t.reshape(bcg, ghi, wo)            # leading-dim split; ghi % 8 == 0 -> free
    wh_b = jnp.broadcast_to(whg_ref[...], (bcg, gho, ghi))
    out = lax.dot_general(
        wh_b, t3,
        dimension_numbers=(((2,), (1,)), ((0,), (0,))),
        preferred_element_type=jnp.float32)                               # (bcg, G*Ho, Wo)
    o_ref[...] = out.reshape(bcg * gho, wo).astype(o_ref.dtype)


class Interpolate:
    """Pallas TPU equivalent of the PyTorch Interpolate module (bilinear)."""

    _MAX_GROUPS_PER_STEP = 256     # bounds batched-dot size / Wh broadcast copies

    def __init__(self, scale_factor, mode="bilinear", align_corners=False):
        assert mode == "bilinear", "only bilinear mode implemented"
        # TODO(synk): 'nearest' / 'bicubic' interpolate modes not implemented.
        self.scale_factor = scale_factor
        self.mode = mode
        self.align_corners = align_corners

    @staticmethod
    def _vmem_limit_bytes() -> int:
        cap = None
        try:
            cap = getattr(pltpu.get_tpu_info(), "vmem_capacity_bytes", None)
        except Exception:
            cap = None
        if not cap:
            cap = 64 * 1024 * 1024            # conservative (v7x per-TC physical)
        # ~70% of physical VMEM, capped: ~90 MiB on v5e/v6e, ~45 MiB on v7x.
        return int(min(cap * 7 // 10, 96 * 1024 * 1024))

    def __call__(self, x: jnp.ndarray) -> jnp.ndarray:
        n, c, hi, wi = x.shape
        sf = self.scale_factor
        sf_h, sf_w = (sf if isinstance(sf, (tuple, list)) else (sf, sf))
        ho = int(math.floor(hi * sf_h))
        wo = int(math.floor(wi * sf_w))
        # TODO(synk): fractional scale factors may need PyTorch's exact size rule.

        cdt = x.dtype if jnp.issubdtype(x.dtype, jnp.floating) else jnp.float32
        x = x.astype(cdt)
        isz = jnp.dtype(cdt).itemsize
        sub = max(8, 32 // isz)               # sublane packing of the storage dtype

        nc = n * c
        # Smallest channel-group G that makes both block heights sublane-aligned,
        # so no spatial padding / repack is ever needed (channels stack on sublanes
        # via a free reshape of the NCHW array).
        g = 1
        while (g * hi) % sub or (g * ho) % sub:
            g += 1
        ncp = _round_up(nc, g)                # channel pad only in the rare g ∤ NC case

        vmem_limit = self._vmem_limit_bytes()
        budget = vmem_limit - (2 << 20)       # margin for Mosaic internal scratch

        def workset(d: int) -> int:           # real VMEM bytes live per grid step
            bc = d * g
            fixed = 2 * (wi * wo + (g * ho) * (g * hi)) * 4     # weights (double-buffered)
            per = (2 * bc * hi * wi * isz                        # input block  (x2 buffers)
                   + 2 * bc * ho * wo * isz                      # output block (x2 buffers)
                   + bc * hi * wi * 4                            # x upcast to f32
                   + bc * hi * wo * 4                            # W-pass result t (f32)
                   + d * (g * ho) * (g * hi) * 4                 # broadcast Wh copies
                   + bc * ho * wo * 4)                           # f32 H-pass result
            return fixed + per

        m = ncp // g                          # number of channel groups
        d = 1
        for cand in range(1, m + 1):
            if m % cand:
                continue
            if cand > self._MAX_GROUPS_PER_STEP:
                continue
            if m >= 2 and m // cand < 2:      # keep grid >= 2 (v7x megacore)
                continue
            if workset(cand) <= budget:
                d = max(d, cand)
        bc = d * g
        grid = m // d

        # Interpolation matrices (exact PyTorch index/weight rule), f32 throughout.
        wh = _interp_coeffs(hi, ho, self.align_corners)                   # (Ho, Hi)
        ww = _interp_coeffs(wi, wo, self.align_corners)                   # (Wo, Wi)
        wwt = jnp.asarray(ww.T)                                           # (Wi, Wo)
        whg = jnp.asarray(np.kron(np.eye(g, dtype=np.float32), wh))      # (G*Ho, G*Hi)

        # Free view: NCHW -> (NC*Hi, Wi).  Channel pad only if g does not divide NC.
        x3 = x.reshape(nc, hi, wi)
        if ncp != nc:
            x3 = jnp.pad(x3, ((0, ncp - nc), (0, 0), (0, 0)))
        x2 = x3.reshape(ncp * hi, wi)

        flops = 2 * ncp * (hi * wi * wo + g * ho * hi * wo)
        bytes_accessed = (ncp * hi * wi + ncp * ho * wo) * isz \
            + (wi * wo + g * g * ho * hi) * 4

        out2 = pl.pallas_call(
            _interp_kernel,
            out_shape=jax.ShapeDtypeStruct((ncp * ho, wo), cdt),
            grid_spec=pltpu.PrefetchScalarGridSpec(
                num_scalar_prefetch=0,
                grid=(grid,),
                in_specs=[
                    pl.BlockSpec((wi, wo), lambda i: (0, 0)),           # Ww^T (shared)
                    pl.BlockSpec((g * ho, g * hi), lambda i: (0, 0)),   # kron(I_G, Wh)
                    pl.BlockSpec((bc * hi, wi), lambda i: (i, 0)),      # input rows
                ],
                out_specs=pl.BlockSpec((bc * ho, wo), lambda i: (i, 0)),
            ),
            compiler_params=pltpu.CompilerParams(
                dimension_semantics=("parallel",),
                vmem_limit_bytes=vmem_limit,
            ),
            cost_estimate=pl.CostEstimate(
                flops=int(flops), transcendentals=0,
                bytes_accessed=int(bytes_accessed)),
        )(wwt, whg, x2)

        out = out2.reshape(ncp, ho, wo)
        if ncp != nc:
            out = out[:nc]
        return out.reshape(n, c, ho, wo)      # free reshape back to NCHW


if __name__ == "__main__":
    key = jax.random.PRNGKey(0)
    interp = Interpolate(scale_factor=2, mode="bilinear", align_corners=False)

    # Primary test (shape implied by the module's use in EGAN, small version).
    x = jax.random.normal(key, (2, 4, 16, 16), dtype=jnp.float32)   # NCHW
    out = jax.block_until_ready(interp(x))
    assert out.shape == (2, 4, 32, 32), out.shape
    # jax.image.resize 'linear' uses half-pixel centers, matching PyTorch
    # bilinear with align_corners=False for this upsampling.
    ref = jax.image.resize(x, (2, 4, 32, 32), method="linear")
    np.testing.assert_allclose(np.asarray(out), np.asarray(ref),
                               rtol=1e-5, atol=1e-5)

    # Second test: Hi not a multiple of the sublane packing (exercises g > 1).
    x2 = jax.random.normal(jax.random.PRNGKey(1), (1, 8, 12, 12), dtype=jnp.float32)
    out2 = jax.block_until_ready(interp(x2))
    assert out2.shape == (1, 8, 24, 24), out2.shape
    ref2 = jax.image.resize(x2, (1, 8, 24, 24), method="linear")
    np.testing.assert_allclose(np.asarray(out2), np.asarray(ref2),
                               rtol=1e-5, atol=1e-5)

    print("KERNEL_OK")
</pallas_src>

<mosaic_0001>
module attributes {stable_mosaic.version = 11 : i64} {
  func.func @_interp_kernel(%arg0: i32, %arg1: memref<16x32xf32, #tpu.memory_space<vmem>>, %arg2: memref<32x16xf32, #tpu.memory_space<vmem>>, %arg3: memref<64x16xf32, #tpu.memory_space<vmem>>, %arg4: memref<128x32xf32, #tpu.memory_space<vmem>>) attributes {dimension_semantics = [#tpu.dimension_semantics<parallel>], iteration_bounds = array<i64: 2>, scalar_prefetch = 0 : i64, scratch_operands = 0 : i64, tpu.core_type = #tpu.core_type<tc>, window_params = [{pipeline_mode = #tpu.pipeline_mode<synchronous>, transform_indices = @transform_0, window_bounds = array<i64: 16, 32>}, {pipeline_mode = #tpu.pipeline_mode<synchronous>, transform_indices = @transform_1, window_bounds = array<i64: 32, 16>}, {transform_indices = @transform_2, window_bounds = array<i64: 64, 16>}, {transform_indices = @transform_3, window_bounds = array<i64: 128, 32>}]} {
    %c0 = arith.constant 0 : index
    %c0_0 = arith.constant 0 : index
    %0 = vector.load %arg3[%c0, %c0_0] : memref<64x16xf32, #tpu.memory_space<vmem>>, vector<64x16xf32>
    %c0_1 = arith.constant 0 : index
    %c0_2 = arith.constant 0 : index
    %1 = vector.load %arg1[%c0_1, %c0_2] : memref<16x32xf32, #tpu.memory_space<vmem>>, vector<16x32xf32>
    %cst = arith.constant dense<0.000000e+00> : vector<64x32xf32>
    %2 = tpu.matmul %0, %1, %cst {dimension_numbers = #tpu.dot_dimension_numbers<[1], [0], [0], [1], [0, 0, 1, 1], [], []>} : vector<64x16xf32>, vector<16x32xf32>, vector<64x32xf32> -> vector<64x32xf32>
    %3 = vector.shape_cast %2 : vector<64x32xf32> to vector<4x16x32xf32>
    %c0_3 = arith.constant 0 : index
    %c0_4 = arith.constant 0 : index
    %4 = vector.load %arg2[%c0_3, %c0_4] : memref<32x16xf32, #tpu.memory_space<vmem>>, vector<32x16xf32>
    %5 = vector.shape_cast %4 : vector<32x16xf32> to vector<1x32x16xf32>
    %6 = vector.broadcast %5 : vector<1x32x16xf32> to vector<4x32x16xf32>
    %cst_5 = arith.constant dense<0.000000e+00> : vector<4x32x32xf32>
    %7 = tpu.matmul %6, %3, %cst_5 {dimension_numbers = #tpu.dot_dimension_numbers<[2], [1], [1], [2], [0, 0, 0, 1, 1, 2], [0], [0]>} : vector<4x32x16xf32>, vector<4x16x32xf32>, vector<4x32x32xf32> -> vector<4x32x32xf32>
    %8 = vector.shape_cast %7 : vector<4x32x32xf32> to vector<128x32xf32>
    %c0_6 = arith.constant 0 : index
    %c0_7 = arith.constant 0 : index
    %9 = vector.load %arg4[%c0_6, %c0_7] : memref<128x32xf32, #tpu.memory_space<vmem>>, vector<128x32xf32>
    tpu.vector_store %arg4[%c0_6, %c0_7], %8 {strides = array<i32>} : memref<128x32xf32, #tpu.memory_space<vmem>>, vector<128x32xf32>,
    return
  }
  func.func @transform_0(%arg0: i32) -> (i32, i32) {
    %c0_i32 = arith.constant 0 : i32
    %c0_i32_0 = arith.constant 0 : i32
    %c0_i32_1 = arith.constant 0 : i32
    return %c0_i32, %c0_i32_0 : i32, i32
  }
  func.func @transform_1(%arg0: i32) -> (i32, i32) {
    %c0_i32 = arith.constant 0 : i32
    %c0_i32_0 = arith.constant 0 : i32
    %c0_i32_1 = arith.constant 0 : i32
    return %c0_i32, %c0_i32_0 : i32, i32
  }
  func.func @transform_2(%arg0: i32) -> (i32, i32) {
    %c0_i32 = arith.constant 0 : i32
    %c0_i32_0 = arith.constant 0 : i32
    return %arg0, %c0_i32 : i32, i32
  }
  func.func @transform_3(%arg0: i32) -> (i32, i32) {
    %c0_i32 = arith.constant 0 : i32
    %c0_i32_0 = arith.constant 0 : i32
    return %arg0, %c0_i32 : i32, i32
  }
}

</mosaic_0001>

<bundles_post_ra>
// kernel: tpu_custom_call.1
= control target key start
LH: loop header
LB: loop body
LE: loop exit
PB: predicated region body
PF: predicated region fallthrough
CT: control target
= control target key end

     0   :  { %s924_s12 = smov 0   ;;  %s1021_s0 = inlined_call_operand.vmem [shape: f32[16,32], index: 0, kind: input, shape index: {}]   ;;  %s1022_s1 = inlined_call_operand.vmem [shape: f32[32,16], index: 1, kind: input, shape index: {}]   ;;  %s1023_s2 = inlined_call_operand.vmem [shape: f32[128,16], index: 2, kind: input, shape index: {}]   ;;  %s1024_s3 = inlined_call_operand.vmem [shape: f32[256,32], index: 3, kind: output, shape index: {}]  }
   0x1 LB: > { %s743_s13 = sadd.s32 4294967295, %s902_s12   ;;  %p747_p0 = scmp.ge.s32.totalorder %s902_s12, 1  ;;  %s902_s12 = sphi %s924_s12, %s13_s12  }
   0x2   : > { %p138_p1 = scmp.lt.s32.totalorder %s902_s12, 3 }
   0x4   : > { %p139_p2 = pnand %p747_p0, %p138_p1 }
   0x5   : > { %v182_v0 = vld [vmem:[%s1021_s0] sm:$0xff] (!%p139_p2)  ;;  %v183_v1 = vld [vmem:[%s1021_s0 + $0x8] sm:$0xff] (!%p139_p2)  ;;  %s748_s18 = sshll.u32 (!%p139_p2), %s743_s13, 3  ;;  %vm184_vm0 = vcmask (!%p139_p2), 130048   ;;  %v316_v19 = vld [vmem:[%s1022_s1 + $0x10] sm:$0xff] (!%p139_p2)  ;;  %s750_s4 = sshll.u32 (!%p139_p2), %s743_s13, 4 }
   0x6   : > { %142 = sbr.rel (%p139_p2) target bundleno = 471 (0x1d7), region = 32  ;;  %v868_v2 = vpack.c.bf16 (!%p139_p2), %v183_v1, %v182_v0  ;;  %p163_p3 = scmp.lt.s32.totalorder (!%p139_p2), %s748_s18, 15  ;;  %v314_v11 = vld [vmem:[%s1022_s1] sm:$0xff] (!%p139_p2)  ;;  %v315_v17 = vld [vmem:[%s1022_s1 + $0x8] sm:$0xff] (!%p139_p2)  ;;  %v317_v22 = vld [vmem:[%s1022_s1 + $0x18] sm:$0xff] (!%p139_p2)  ;;  %vm670_vm1 = vcmask (!%p139_p2), 261120  }
   0x7   : > { %832 = vmatprep.mubr.msk.f32.mxu1 (!%p139_p2), %vm184_vm0, %v314_v11  ;;  %p169_p4 = scmp.lt.s32.totalorder (!%p139_p2), %s750_s4, 31 }
   0x8   : > { %869 = vmatprep.subr.bf16.mxu0 (!%p139_p2), %v868_v2 }
   0x9   : > { %871 = vmatpush3.bf16.msra.mxu0 (!%p139_p2), %v868_v2 }
   0xd   : > { %s1026_s18 = smov (!%p163_p3, %s748_s18), 15  ;;  %s1028_s4 = smov (!%p169_p4, %s750_s4), 31 }
   0xe   : > { %s749_s19 = sshll.u32 %s1026_s18, 3  ;;  %s751_s5 = sshll.u32 %s1028_s4, 3 }
   0xf   : > { %s166_s22 = scalar_lea.vmem %s1023_s2, %s749_s19  ;;  %s984_s8 = scalar_lea.vmem %s1024_s3, %s751_s5 }
  0x10   : > { %v174_v3 = vld [vmem:[%s166_s22] sm:$0xff]  ;;  %v175_v4 = vld [vmem:[%s166_s22 + $0x8] sm:$0xff]  ;;  %v176_v5 = vld [vmem:[%s166_s22 + $0x10] sm:$0xff] }
  0x11   : > { %816 = vmatprep.mubr.msk.f32.mxu0 %vm184_vm0, %v174_v3  ;;  %v177_v6 = vld [vmem:[%s166_s22 + $0x18] sm:$0xff]  ;;  %v178_v7 = vld [vmem:[%s166_s22 + $0x20] sm:$0xff]  ;;  %v179_v8 = vld [vmem:[%s166_s22 + $0x28] sm:$0xff] }
  0x12   : > { %817 = vmatmul.mubr.msk.f32.vlgmr.msra.gmra.mrb[0].mxu0 %vm184_vm0, %v175_v4  ;;  %v180_v9 = vld [vmem:[%s166_s22 + $0x30] sm:$0xff]  ;;  %v181_v10 = vld [vmem:[%s166_s22 + $0x38] sm:$0xff] }
  0x13   : > { %819 = vmatprep.mubr.msk.f32.mxu0 %vm184_vm0, %v176_v5 }
  0x16   : > { %820 = vmatmul.mubr.msk.f32.gmra.mrb[2].mxu0 %vm184_vm0, %v177_v6 }
  0x17   : > { %822 = vmatprep.mubr.msk.f32.mxu0 %vm184_vm0, %v178_v7 }
  0x1a   : > { %823 = vmatmul.mubr.msk.f32.gmra.mrb[4].mxu0 %vm184_vm0, %v179_v8 }
  0x1b   : > { %825 = vmatprep.mubr.msk.f32.mxu0 %vm184_vm0, %v180_v9 }
  0x1e   : > { %826 = vmatmul.mubr.msk.f32.gmra.mrb[6].mxu0 %vm184_vm0, %v181_v10 }
  0x1f   : > { %852 = vmatprep.mubr.msk.f32.mxu0 %vm184_vm0, %v314_v11 }
  0xe5   : > { %v818_v12 = vpop.f32.mrb[0].mxu0 }
  0xe6   : > { %v275_v13 = vpop.f32.mrb[1].mxu0 }
  0xe7   : > { %v872_v14 = vpack.c.bf16 %v818_v12, %v275_v13 }
  0xe9   : > { %v821_v15 = vpop.f32.mrb[2].mxu0  ;;  %873 = vmatprep.subr.bf16.mxu1 %v872_v14 }
  0xea   : > { %v285_v16 = vpop.f32.mrb[3].mxu0  ;;  %875 = vmatpush3.bf16.msra.mxu1 %v872_v14 }
  0xeb   : > { %v876_v18 = vpack.c.bf16 %v821_v15, %v285_v16 }
  0xed   : > { %v824_v20 = vpop.f32.mrb[4].mxu0  ;;  %877 = vmatprep.subr.bf16.mxu1 %v876_v18  ;;  %833 = vmatmul.mubr.msk.f32.vlgmr.msra.gmra.mrb[0].mxu1 %vm184_vm0, %v315_v17 }
  0xee   : > { %v295_v21 = vpop.f32.mrb[5].mxu0  ;;  %879 = vmatpush3.bf16.msra.mxu1 %v876_v18  ;;  %835 = vmatprep.mubr.msk.f32.mxu1 %vm184_vm0, %v316_v19 }
  0xef   : > { %v880_v23 = vpack.c.bf16 %v824_v20, %v295_v21 }
  0xf1   : > { %881 = vmatprep.subr.bf16.mxu0 %v880_v23  ;;  %v827_v24 = vpop.f32.mrb[6].mxu0  ;;  %836 = vmatmul.mubr.msk.f32.gmra.mrb[2].mxu1 %vm184_vm0, %v317_v22 }
  0xf2   : > { %883 = vmatpush3.bf16.msra.mxu0 %v880_v23  ;;  %v305_v25 = vpop.f32.mrb[7].mxu0  ;;  %842 = vmatprep.mubr.msk.f32.mxu1 %vm184_vm0, %v314_v11 }
  0xf3   : > { %v884_v26 = vpack.c.bf16 %v827_v24, %v305_v25 }
  0xf5   : > { %885 = vmatprep.subr.bf16.mxu1 %v884_v26  ;;  %843 = vmatmul.mubr.msk.f32.vlgmr.msra.gmra.mrb[4].mxu1 %vm184_vm0, %v315_v17 }
  0xf6   : > { %887 = vmatpush3.bf16.msra.mxu1 %v884_v26  ;;  %845 = vmatprep.mubr.msk.f32.mxu1 %vm184_vm0, %v316_v19 }
  0xf7   : > { %853 = vmatmul.mubr.msk.f32.vlgmr.msra.gmra.mrb[8].mxu0 %vm184_vm0, %v315_v17 }
  0xf8   : > { %855 = vmatprep.mubr.msk.f32.mxu0 %vm184_vm0, %v316_v19 }
  0xf9   : > { %846 = vmatmul.mubr.msk.f32.gmra.mrb[6].mxu1 %vm184_vm0, %v317_v22 }
  0xfa   : > { %862 = vmatprep.mubr.msk.f32.mxu1 %vm184_vm0, %v314_v11 }
  0xfb   : > { %856 = vmatmul.mubr.msk.f32.gmra.mrb[10].mxu0 %vm184_vm0, %v317_v22 }
  0xfd   : > { %863 = vmatmul.mubr.msk.f32.vlgmr.msra.gmra.mrb[8].mxu1 %vm184_vm0, %v315_v17 }
  0xfe   : > { %865 = vmatprep.mubr.msk.f32.mxu1 %vm184_vm0, %v316_v19 }
 0x101   : > { %866 = vmatmul.mubr.msk.f32.gmra.mrb[10].mxu1 %vm184_vm0, %v317_v22 }
 0x1c0   : > { %v834_v27 = vpop.f32.mrb[0].mxu1 }
 0x1c1   : > { %672 = vst.msk [vmem:[%s984_s8 + $0x8] sm:$0xff] %vm670_vm1, %v834_v27  ;;  %v396_v28 = vpop.f32.mrb[1].mxu1 }
 0x1c2   : > { %671 = vst.msk [vmem:[%s984_s8] sm:$0xff] %vm670_vm1, %v396_v28 }
 0x1c4   : > { %v837_v29 = vpop.f32.mrb[2].mxu1 }
 0x1c5   : > { %674 = vst.msk [vmem:[%s984_s8 + $0x18] sm:$0xff] %vm670_vm1, %v837_v29  ;;  %v406_v30 = vpop.f32.mrb[3].mxu1 }
 0x1c6   : > { %673 = vst.msk [vmem:[%s984_s8 + $0x10] sm:$0xff] %vm670_vm1, %v406_v30 }
 0x1c8   : > { %v844_v31 = vpop.f32.mrb[4].mxu1 }
 0x1c9   : > { %676 = vst.msk [vmem:[%s984_s8 + $0x28] sm:$0xff] %vm670_vm1, %v844_v31  ;;  %v481_v32 = vpop.f32.mrb[5].mxu1 }
 0x1ca   : > { %675 = vst.msk [vmem:[%s984_s8 + $0x20] sm:$0xff] %vm670_vm1, %v481_v32  ;;  %v854_v33 = vpop.f32.mrb[8].mxu0 }
 0x1cb   : > { %680 = vst.msk [vmem:[%s984_s8 + $0x48] sm:$0xff] %vm670_vm1, %v854_v33  ;;  %v566_v34 = vpop.f32.mrb[9].mxu0 }
 0x1cc   : > { %v847_v35 = vpop.f32.mrb[6].mxu1  ;;  %679 = vst.msk [vmem:[%s984_s8 + $0x40] sm:$0xff] %vm670_vm1, %v566_v34 }
 0x1cd   : > { %678 = vst.msk [vmem:[%s984_s8 + $0x38] sm:$0xff] %vm670_vm1, %v847_v35  ;;  %v491_v36 = vpop.f32.mrb[7].mxu1 }
 0x1ce   : > { %677 = vst.msk [vmem:[%s984_s8 + $0x30] sm:$0xff] %vm670_vm1, %v491_v36  ;;  %v857_v37 = vpop.f32.mrb[10].mxu0 }
 0x1cf   : > { %682 = vst.msk [vmem:[%s984_s8 + $0x58] sm:$0xff] %vm670_vm1, %v857_v37  ;;  %v576_v38 = vpop.f32.mrb[11].mxu0 }
 0x1d0   : > { %v864_v39 = vpop.f32.mrb[8].mxu1  ;;  %681 = vst.msk [vmem:[%s984_s8 + $0x50] sm:$0xff] %vm670_vm1, %v576_v38 }
 0x1d1   : > { %684 = vst.msk [vmem:[%s984_s8 + $0x68] sm:$0xff] %vm670_vm1, %v864_v39  ;;  %v651_v40 = vpop.f32.mrb[9].mxu1 }
 0x1d2   : > { %683 = vst.msk [vmem:[%s984_s8 + $0x60] sm:$0xff] %vm670_vm1, %v651_v40 }
 0x1d4   : > { %v867_v41 = vpop.f32.mrb[10].mxu1 }
 0x1d5   : > { %686 = vst.msk [vmem:[%s984_s8 + $0x78] sm:$0xff] %vm670_vm1, %v867_v41  ;;  %v661_v42 = vpop.f32.mrb[11].mxu1 }
 0x1d6   : > { %685 = vst.msk [vmem:[%s984_s8 + $0x70] sm:$0xff] %vm670_vm1, %v661_v42 }
 0x1d7 PF: > { %s13_s12 = sadd.s32 1, %s902_s12  }
 0x1d8   : > { %p10_p5 = scmp.ge.s32.totalorder %s13_s12, 4  }
 0x1da   :  { %12 = sbr.rel (!%p10_p5) target bundleno = 1 (0x1), region = 62 }

</bundles_post_ra>
